<compile_context>
chip_gen: v7x
topology: tpu7x:2x2x1
jax: 0.10.0
libtpu: 0.0.40
codegen_flags: <defaults>
</compile_context>

<pallas_src>
import math

import jax
import jax.numpy as jnp
from jax.experimental import pallas as pl
from jax.experimental.pallas import tpu as pltpu


# ----------------------------- kernels ---------------------------------------


def _add_pe_kernel(x_ref, pe_ref, o_ref):
    # Elementwise broadcast-add; pe broadcasts over the leading (batch) axis.
    o_ref[...] = x_ref[...] + pe_ref[...]


def _add_pe_dropout_kernel(x_ref, pe_ref, m_ref, o_ref):
    # Inverted dropout: mask already carries the 1/(1-p) scaling (or 0).
    o_ref[...] = (x_ref[...] + pe_ref[...]) * m_ref[...]


# ----------------------------- parameter setup (glue) -------------------------


def make_periodic_pe(d_model, period=25, max_seq_len=600, dtype=jnp.float32):
    """Same buffer as the PyTorch __init__ (shape (repeat*period, d_model))."""
    position = jnp.arange(period, dtype=jnp.float32)[:, None]            # (period, 1)
    div_term = jnp.exp(
        jnp.arange(0, d_model, 2, dtype=jnp.float32) * (-math.log(10000.0) / d_model)
    )                                                                     # (d_model/2,)
    pe = jnp.zeros((period, d_model), dtype=jnp.float32)
    pe = pe.at[:, 0::2].set(jnp.sin(position * div_term))
    pe = pe.at[:, 1::2].set(jnp.cos(position * div_term))
    repeat_num = max_seq_len // period + 1
    pe = jnp.tile(pe, (repeat_num, 1))                                    # (repeat*period, d_model)
    return pe.astype(dtype)


# ----------------------------- wrapper ----------------------------------------

# Conservative per-kernel block budget: keeps double-buffered x/out/pe (and the
# optional dropout mask) well inside v7x's 32 MiB scoped / 64 MiB physical VMEM.
_VMEM_BUDGET = 8 << 20


def periodic_positional_encoding(x, pe, *, dropout_p=0.1, training=False, rng=None):
    """x: (B, S, D).  pe: (max_len_padded, D).  Returns (B, S, D)."""
    B, S, D = x.shape
    if S > pe.shape[0]:
        raise ValueError(
            f"sequence length {S} exceeds positional table length {pe.shape[0]}")

    dsize = jnp.dtype(x.dtype).itemsize
    # Cast once in the wrapper (halves pe DMA bytes for bf16 x, removes the
    # per-block VPU cast inside the kernel).
    pe_slice = pe[:S, :].astype(x.dtype)

    use_dropout = bool(training) and float(dropout_p) > 0.0
    mask = None
    if use_dropout:
        if rng is None:
            rng = jax.random.PRNGKey(0)
        keep = jax.random.uniform(rng, (B, S, D), dtype=jnp.float32) >= dropout_p
        mask = jnp.where(keep, 1.0 / (1.0 - float(dropout_p)), 0.0).astype(x.dtype)

    N = S * D
    flops = B * N * (2 if use_dropout else 1)
    bytes_accessed = dsize * (2 * B * N + N + (B * N if use_dropout else 0))
    cost = pl.CostEstimate(flops=flops, transcendentals=0,
                           bytes_accessed=bytes_accessed)
    cparams = pltpu.CompilerParams(dimension_semantics=("parallel",))

    if N % 128 == 0:
        # ---- lane-dense path: collapse (S, D) into one flat feature axis ----
        x2 = x.reshape(B, N)
        pe2 = pe_slice.reshape(1, N)
        # double-buffered x + out (+ mask) blocks plus the pe block, per feature
        feat_bytes = dsize * ((4 * B + 2) + (2 * B if use_dropout else 0))
        if N * feat_bytes <= _VMEM_BUDGET:
            tile = N                                   # single grid step
        else:
            tile = min(N, max(128, (_VMEM_BUDGET // feat_bytes) // 128 * 128))
        grid = (pl.cdiv(N, tile),)
        blk = pl.BlockSpec((B, tile), lambda i: (0, i))
        pe_blk = pl.BlockSpec((1, tile), lambda i: (0, i))

        if use_dropout:
            out2 = pl.pallas_call(
                _add_pe_dropout_kernel,
                out_shape=jax.ShapeDtypeStruct((B, N), x.dtype),
                grid=grid,
                in_specs=[blk, pe_blk, blk],
                out_specs=blk,
                compiler_params=cparams,
                cost_estimate=cost,
            )(x2, pe2, mask.reshape(B, N))
        else:
            out2 = pl.pallas_call(
                _add_pe_kernel,
                out_shape=jax.ShapeDtypeStruct((B, N), x.dtype),
                grid=grid,
                in_specs=[blk, pe_blk],
                out_specs=blk,
                compiler_params=cparams,
                cost_estimate=cost,
            )(x2, pe2)
        return out2.reshape(B, S, D)

    # ---- fallback path (S*D not a multiple of 128): keep (B, S, D) blocks ----
    # Tile the sequence axis (multiple of 8, or full S) to stay under budget.
    row_bytes = dsize * D * ((4 * B + 2) + (2 * B if use_dropout else 0))
    if S <= 8 or S * row_bytes <= _VMEM_BUDGET:
        tile_s = S
    else:
        tile_s = max(8, min((S // 8) * 8, (_VMEM_BUDGET // row_bytes) // 8 * 8))
    grid = (pl.cdiv(S, tile_s),)
    blk = pl.BlockSpec((B, tile_s, D), lambda s: (0, s, 0))
    pe_blk = pl.BlockSpec((tile_s, D), lambda s: (s, 0))

    if use_dropout:
        return pl.pallas_call(
            _add_pe_dropout_kernel,
            out_shape=jax.ShapeDtypeStruct((B, S, D), x.dtype),
            grid=grid,
            in_specs=[blk, pe_blk, blk],
            out_specs=blk,
            compiler_params=cparams,
            cost_estimate=cost,
        )(x, pe_slice, mask)
    return pl.pallas_call(
        _add_pe_kernel,
        out_shape=jax.ShapeDtypeStruct((B, S, D), x.dtype),
        grid=grid,
        in_specs=[blk, pe_blk],
        out_specs=blk,
        compiler_params=cparams,
        cost_estimate=cost,
    )(x, pe_slice)


# ----------------------------- main -------------------------------------------

if __name__ == "__main__":
    # Small shapes consistent with the module: batch=2, seq=8, d_model=32.
    B, S, D = 2, 8, 32
    key = jax.random.PRNGKey(0)
    x = jax.random.normal(key, (B, S, D), dtype=jnp.float32)
    pe = make_periodic_pe(d_model=D, period=25, max_seq_len=600)

    # Eval mode (dropout identity); lane-dense path (S*D = 256 is lane-aligned).
    out = jax.block_until_ready(
        periodic_positional_encoding(x, pe, dropout_p=0.1, training=False))
    ref = x + pe[:S, :][None, :, :]
    assert out.shape == (B, S, D)
    assert jnp.allclose(out, ref, atol=1e-6), "mismatch vs reference x + pe"

    # Exercise the non-lane-dense fallback path (S*D % 128 != 0).
    D2 = 24
    x2 = jax.random.normal(jax.random.PRNGKey(1), (B, S, D2), dtype=jnp.float32)
    pe2 = make_periodic_pe(d_model=D2, period=25, max_seq_len=600)
    out2 = jax.block_until_ready(
        periodic_positional_encoding(x2, pe2, dropout_p=0.1, training=False))
    ref2 = x2 + pe2[:S, :][None, :, :]
    assert jnp.allclose(out2, ref2, atol=1e-6), "mismatch vs reference (fallback)"

    # Training-mode (inverted dropout via wrapper-generated mask) path.
    out_train = jax.block_until_ready(
        periodic_positional_encoding(x, pe, dropout_p=0.1, training=True,
                                     rng=jax.random.PRNGKey(123)))
    assert out_train.shape == (B, S, D)

    print("KERNEL_OK")
</pallas_src>

<mosaic_0001>
module attributes {stable_mosaic.version = 11 : i64} {
  func.func @_add_pe_kernel(%arg0: i32, %arg1: memref<2x256xf32, #tpu.memory_space<vmem>>, %arg2: memref<1x256xf32, #tpu.memory_space<vmem>>, %arg3: memref<2x256xf32, #tpu.memory_space<vmem>>) attributes {dimension_semantics = [#tpu.dimension_semantics<parallel>], iteration_bounds = array<i64: 1>, scalar_prefetch = 0 : i64, scratch_operands = 0 : i64, tpu.core_type = #tpu.core_type<tc>, window_params = [{transform_indices = @transform_0, window_bounds = array<i64: 2, 256>}, {transform_indices = @transform_1, window_bounds = array<i64: 1, 256>}, {transform_indices = @transform_2, window_bounds = array<i64: 2, 256>}]} {
    %c0 = arith.constant 0 : index
    %c0_0 = arith.constant 0 : index
    %0 = vector.load %arg1[%c0, %c0_0] : memref<2x256xf32, #tpu.memory_space<vmem>>, vector<2x256xf32>
    %c0_1 = arith.constant 0 : index
    %c0_2 = arith.constant 0 : index
    %1 = vector.load %arg2[%c0_1, %c0_2] : memref<1x256xf32, #tpu.memory_space<vmem>>, vector<1x256xf32>
    %2 = vector.broadcast %1 : vector<1x256xf32> to vector<2x256xf32>
    %3 = arith.addf %0, %2 : vector<2x256xf32>
    %c0_3 = arith.constant 0 : index
    %c0_4 = arith.constant 0 : index
    %4 = vector.load %arg3[%c0_3, %c0_4] : memref<2x256xf32, #tpu.memory_space<vmem>>, vector<2x256xf32>
    tpu.vector_store %arg3[%c0_3, %c0_4], %3 {strides = array<i32>} : memref<2x256xf32, #tpu.memory_space<vmem>>, vector<2x256xf32>,
    return
  }
  func.func @transform_0(%arg0: i32) -> (i32, i32) {
    %c0_i32 = arith.constant 0 : i32
    %c0_i32_0 = arith.constant 0 : i32
    return %c0_i32, %arg0 : i32, i32
  }
  func.func @transform_1(%arg0: i32) -> (i32, i32) {
    %c0_i32 = arith.constant 0 : i32
    %c0_i32_0 = arith.constant 0 : i32
    return %c0_i32, %arg0 : i32, i32
  }
  func.func @transform_2(%arg0: i32) -> (i32, i32) {
    %c0_i32 = arith.constant 0 : i32
    %c0_i32_0 = arith.constant 0 : i32
    return %c0_i32, %arg0 : i32, i32
  }
}

</mosaic_0001>

<bundles_post_ra>
// kernel: tpu_custom_call.1
= control target key start
LH: loop header
LB: loop body
LE: loop exit
PB: predicated region body
PF: predicated region fallthrough
CT: control target
= control target key end

     0   :  { %7 = vsyncpa [#allocation3], 0  ;;  %s157_s0 = inlined_call_operand.hbm [shape: f32[2,256], index: 0, kind: input, shape index: {}]   ;;  %s158_s1 = inlined_call_operand.vmem [shape: f32[1,256], index: 1, kind: input, shape index: {}]   ;;  %s159_s2 = inlined_call_operand.hbm [shape: f32[2,256], index: 2, kind: output, shape index: {}]  }
   0x1   :  { %8 = vsyncpa [#allocation4], 0  ;;  %s112_s9 = smov [#allocation2]   ;;  %s64_s13 = scalar_lea.hbm %s157_s0, 64 }
   0x2   :  { %s15_s10 = sshll.u32 %s112_s9, 4  ;;  %p65_p0 = scmp.ne.s32.totalorder %s157_s0, %s64_s13  ;;  %s16_s10 = int_to_ptr.vmem [resolvable:$true] %s15_s10 }
   0x3   :  { %p68_p1 = scmp.lt.u32.totalorder %s64_s13, %s157_s0 }
   0x5   :  { %p70_p2 = pnand %p68_p1, %p65_p0 }
   0x7   :  { %73 = shalt.err (!%p70_p2)
}
   0x8   :  { %s74_s18 = scalar_lea.vmem %s16_s10, 64  ;;  %p79_p4 = scmp.lt.s32.totalorder %s16_s10, %s16_s10 }
   0x9   :  { %p75_p3 = scmp.ne.s32.totalorder %s16_s10, %s74_s18  ;;  %p80_p5 = scmp.lt.s32.totalorder %s74_s18, %s74_s18 }
   0xb   :  { %p81_p6 = por %p80_p5, %p79_p4 }
   0xd   :  { %p82_p7 = pnand %p81_p6, %p75_p3 }
   0xf   :  { %85 = shalt.err (!%p82_p7)
}
  0x10   :  { %18 = dma.hbm_to_vmem [thread:$0]  %s157_s0, 64, %s16_s10, [#allocation3]  }
  0x11   :  { %108 = dma.done.wait [#allocation3], 64  }
  0x12   :  { %109 = vsyncadd [#allocation3], 4294967232  ;;  %v27_v0 = vlaneseq  ;;  %v113_v1 = vmov 1983009808   ;;  %v25_v7 = vld [vmem:[%s158_s1] sm:$0x3] }
  0x13   :  { %v37_v2 = vunpack.c.l.s4 %v113_v1  ;;  %v24_v12 = vld [vmem:[#allocation2] sm:$0xf]  ;;  %s114_s23 = smov [#allocation5]  }
  0x14   :  { %v28_v3 = vshrl.u32 %v27_v0, 7  ;;  %s52_s0 = sshll.u32 %s114_s23, 4  ;;  %s53_s0 = int_to_ptr.vmem [resolvable:$true] %s52_s0 }
  0x15   :  { %v38_v6 = vunpack.c.0.s8 %v37_v2  ;;  %s86_s24 = scalar_lea.vmem %s53_s0, 64  ;;  %p91_p9 = scmp.lt.s32.totalorder %s53_s0, %s53_s0 }
  0x16   :  { %v29_v4 = vsub.s32 0, %v28_v3  ;;  %v33_v5 = vsub.s32 1, %v28_v3  ;;  %p87_p8 = scmp.ne.s32.totalorder %s53_s0, %s86_s24  ;;  %p92_p10 = scmp.lt.s32.totalorder %s86_s24, %s86_s24 }
  0x17   :  { %v41_v10 = vsub.s32 %v38_v6, %v28_v3 }
  0x18   :  { %v30_v8 = vrot.slane %v25_v7, %v29_v4  ;;  %v34_v9 = vrot.slane %v25_v7, %v33_v5  ;;  %p93_p11 = por %p92_p10, %p91_p9 }
  0x1a   :  { %v35_v11 = vcombine.low %v30_v8, %v34_v9  ;;  %p94_p12 = pnand %p93_p11, %p87_p8 }
  0x1c   :  { %v42_v13 = vrot.slane %v35_v11, %v41_v10 }
  0x1e   :  { %v44_v14 = vadd.f32 %v42_v13, %v24_v12 }
  0x20   :  { %45 = vst [vmem:[#allocation5] sm:$0xf] %v44_v14 }
  0x21   :  { %97 = shalt.err (!%p94_p12)
}
  0x22   :  { %s98_s26 = scalar_lea.hbm %s159_s2, 64 }
  0x23   :  { %p99_p13 = scmp.ne.s32.totalorder %s159_s2, %s98_s26  ;;  %p102_p0 = scmp.lt.u32.totalorder %s98_s26, %s159_s2 }
  0x25   :  { %p104_p1 = pnand %p102_p0, %p99_p13 }
  0x27   :  { %107 = shalt.err (!%p104_p1)
}
  0x28   :  { %55 = dma.vmem_to_hbm [thread:$0]  %s53_s0, 64, %s159_s2, [#allocation4]  }
  0x29   :  { %110 = dma.done.wait [#allocation4], 64  }
  0x2a   :  { %111 = vsyncadd [#allocation4], 4294967232 }
  0x2b   :  { %59 = vsyncpa [#allocation3], 1 }
  0x2c   :  { %60 = vsyncpa [#allocation4], 1 }

</bundles_post_ra>
